<compile_context>
chip_gen: v7x
topology: tpu7x:2x2x1
jax: 0.10.0
libtpu: 0.0.40
codegen_flags: <defaults>
</compile_context>

<pallas_src>
import functools

import jax
import jax.numpy as jnp
from jax.experimental import pallas as pl
from jax.experimental.pallas import tpu as pltpu


def _adaptive_act_kernel(alpha_ref, x_ref, o_ref, *, compute_dtype):
    # alpha_ref: (1, 1) f32 in SMEM; x_ref/o_ref: (block_rows, lane) in VMEM.
    alpha = alpha_ref[0, 0].astype(compute_dtype)
    y = jnp.tanh(alpha * x_ref[...].astype(compute_dtype))
    o_ref[...] = y.astype(o_ref.dtype)


def _tpu_config():
    """Generation-aware (target_block_bytes, vmem_limit_bytes, num_tc, native_bf16)."""
    kind = ""
    try:
        kind = jax.devices()[0].device_kind.lower()
    except Exception:
        pass
    if "v7" in kind:
        # 3.2 TB/s HBM: amortize the ~0.35us/step overhead with ~7 MiB tiles;
        # 4 x 7 MiB double-buffered in+out needs the scoped limit raised.
        return (7 << 20, 48 << 20, 2, True)
    if "v6" in kind:
        return (4 << 20, None, 1, True)   # 16 MiB footprint < 32 MiB default scoped VMEM
    if "v5" in kind:
        return (2 << 20, None, 1, False)  # 8 MiB footprint < 16 MiB default; f32 compute only
    return (2 << 20, None, 1, False)      # conservative default


def _adaptive_activation_2d(x2d, alpha_arr, cfg):
    rows, lane = x2d.shape
    itemsize = x2d.dtype.itemsize
    target_block_bytes, vmem_limit, num_tc, native_bf16 = cfg

    # Native-bf16 compute only where the VPU/EUP supports it (v6e/v7x).
    if native_bf16 and x2d.dtype == jnp.bfloat16:
        compute_dtype = jnp.bfloat16
    else:
        compute_dtype = jnp.float32

    # Packed-sublane multiple: 8 (f32), 16 (bf16/f16), 32 (int8/fp8).
    sub = max(8, 32 // max(1, itemsize))

    block_rows = max(sub, (target_block_bytes // (lane * itemsize)) // sub * sub)

    # v7x: guarantee >= 2 grid steps on non-trivial slabs so both TensorCores
    # get work under dimension_semantics=("parallel",).
    slab_bytes = rows * lane * itemsize
    if num_tc >= 2 and slab_bytes > (4 << 20):
        half = ((pl.cdiv(rows, 2) + sub - 1) // sub) * sub
        block_rows = min(block_rows, half)

    if block_rows >= rows:
        block_rows = rows  # single full block; always layout-legal

    grid = (pl.cdiv(rows, block_rows),)
    kernel = functools.partial(_adaptive_act_kernel, compute_dtype=compute_dtype)

    return pl.pallas_call(
        kernel,
        out_shape=jax.ShapeDtypeStruct((rows, lane), x2d.dtype),
        grid=grid,
        in_specs=[
            pl.BlockSpec(memory_space=pltpu.MemorySpace.SMEM),    # alpha scalar
            pl.BlockSpec((block_rows, lane), lambda i: (i, 0)),   # x tile
        ],
        out_specs=pl.BlockSpec((block_rows, lane), lambda i: (i, 0)),
        compiler_params=pltpu.CompilerParams(
            dimension_semantics=("parallel",),
            vmem_limit_bytes=vmem_limit),
        cost_estimate=pl.CostEstimate(
            flops=rows * lane,                      # one mul per element
            transcendentals=rows * lane,            # one tanh per element
            bytes_accessed=2 * rows * lane * itemsize),
    )(alpha_arr, x2d)


def adaptive_activation(x, alpha):
    """tanh(alpha * x), elementwise — AdaptiveActivation.forward."""
    orig_shape = x.shape
    n = x.size
    if n == 0:
        return x

    cfg = _tpu_config()
    alpha_arr = jnp.asarray(alpha, dtype=jnp.float32).reshape(1, 1)

    # Widest lane-dense last dim (multiple of 128) dividing n -> free reshape.
    lane = None
    for cand in (16384, 8192, 4096, 2048, 1024, 512, 256, 128):
        if n % cand == 0:
            lane = cand
            break

    x_flat = jnp.ravel(x)

    if lane is not None:
        rows = n // lane
        out2d = _adaptive_activation_2d(x_flat.reshape(rows, lane), alpha_arr, cfg)
        return out2d.reshape(orig_shape)

    # Rare fallback: n not a multiple of 128. Kernel on the 128-divisible
    # prefix; plain jnp.tanh on the (<128 element) tail. Avoids full-array
    # pad + slice copies of the bandwidth-bound main path.
    lane = 128
    n_main = (n // lane) * lane
    alpha_f32 = alpha_arr[0, 0]
    pieces = []
    if n_main:
        main = _adaptive_activation_2d(
            x_flat[:n_main].reshape(n_main // lane, lane), alpha_arr, cfg)
        pieces.append(main.reshape(-1))
    tail = x_flat[n_main:]
    pieces.append(jnp.tanh(alpha_f32 * tail.astype(jnp.float32)).astype(x.dtype))
    return jnp.concatenate(pieces).reshape(orig_shape)


if __name__ == "__main__":
    key = jax.random.PRNGKey(0)
    # Small NCHW conv-style activation input.
    x = jax.random.normal(key, (2, 4, 16, 16), dtype=jnp.float32)

    # Parameter from __init__: alpha initialized to 0.9 (deterministic).
    alpha = jnp.float32(0.9)

    out = jax.block_until_ready(adaptive_activation(x, alpha))

    # Reference check (plain JAX) — same semantics as torch.tanh(alpha * x).
    ref = jnp.tanh(alpha * x)
    assert out.shape == x.shape and out.dtype == x.dtype
    assert jnp.max(jnp.abs(out - ref)) < 1e-6

    print("KERNEL_OK")
</pallas_src>

<mosaic_0001>
module attributes {stable_mosaic.version = 11 : i64} {
  func.func @_adaptive_act_kernel(%arg0: i32, %arg1: memref<1x1xf32, #tpu.memory_space<smem>>, %arg2: memref<1x2048xf32, #tpu.memory_space<vmem>>, %arg3: memref<1x2048xf32, #tpu.memory_space<vmem>>) attributes {dimension_semantics = [#tpu.dimension_semantics<parallel>], iteration_bounds = array<i64: 1>, scalar_prefetch = 0 : i64, scratch_operands = 0 : i64, tpu.core_type = #tpu.core_type<tc>, window_params = [{transform_indices = @transform_0, window_bounds = array<i64: 1, 1>}, {transform_indices = @transform_1, window_bounds = array<i64: 1, 2048>}, {transform_indices = @transform_2, window_bounds = array<i64: 1, 2048>}]} {
    %c0 = arith.constant 0 : index
    %c0_0 = arith.constant 0 : index
    %0 = memref.load %arg1[%c0, %c0_0] : memref<1x1xf32, #tpu.memory_space<smem>>
    %c0_1 = arith.constant 0 : index
    %c0_2 = arith.constant 0 : index
    %1 = vector.load %arg2[%c0_1, %c0_2] : memref<1x2048xf32, #tpu.memory_space<vmem>>, vector<1x2048xf32>
    %2 = vector.broadcast %0 : f32 to vector<1x2048xf32>
    %3 = arith.mulf %2, %1 : vector<1x2048xf32>
    %4 = math.tanh %3 : vector<1x2048xf32>
    %c0_3 = arith.constant 0 : index
    %c0_4 = arith.constant 0 : index
    %5 = vector.load %arg3[%c0_3, %c0_4] : memref<1x2048xf32, #tpu.memory_space<vmem>>, vector<1x2048xf32>
    tpu.vector_store %arg3[%c0_3, %c0_4], %4 {strides = array<i32>} : memref<1x2048xf32, #tpu.memory_space<vmem>>, vector<1x2048xf32>,
    return
  }
  func.func @transform_0(%arg0: i32) -> (i32, i32) {
    %c0_i32 = arith.constant 0 : i32
    %c0_i32_0 = arith.constant 0 : i32
    %c0_i32_1 = arith.constant 0 : i32
    return %c0_i32, %c0_i32_0 : i32, i32
  }
  func.func @transform_1(%arg0: i32) -> (i32, i32) {
    %c0_i32 = arith.constant 0 : i32
    %c0_i32_0 = arith.constant 0 : i32
    return %arg0, %c0_i32 : i32, i32
  }
  func.func @transform_2(%arg0: i32) -> (i32, i32) {
    %c0_i32 = arith.constant 0 : i32
    %c0_i32_0 = arith.constant 0 : i32
    return %arg0, %c0_i32 : i32, i32
  }
}

</mosaic_0001>

<bundles_post_ra>
// kernel: tpu_custom_call.1
= control target key start
LH: loop header
LB: loop body
LE: loop exit
PB: predicated region body
PF: predicated region fallthrough
CT: control target
= control target key end

     0   :  { %8 = vsyncpa [#allocation4], 0  ;;  %s148_s0 = inlined_call_operand.<no memory space> [shape: f32[1,1], index: 0, kind: input, shape index: {}]   ;;  %s149_s1 = inlined_call_operand.hbm [shape: f32[1,2048], index: 1, kind: input, shape index: {}]   ;;  %s150_s2 = inlined_call_operand.hbm [shape: f32[1,2048], index: 2, kind: output, shape index: {}]  }
   0x1   :  { %9 = vsyncpa [#allocation5], 0  ;;  %s104_s9 = smov [#allocation3]   ;;  %s56_s13 = scalar_lea.hbm %s149_s1, 256 }
   0x2   :  { %s18_s10 = sshll.u32 %s104_s9, 4  ;;  %p57_p0 = scmp.ne.s32.totalorder %s149_s1, %s56_s13  ;;  %s19_s10 = int_to_ptr.vmem [resolvable:$true] %s18_s10 }
   0x3   :  { %p60_p1 = scmp.lt.u32.totalorder %s56_s13, %s149_s1 }
   0x5   :  { %p62_p2 = pnand %p60_p1, %p57_p0 }
   0x7   :  { %65 = shalt.err (!%p62_p2)
}
   0x8   :  { %s66_s18 = scalar_lea.vmem %s19_s10, 256  ;;  %p71_p4 = scmp.lt.s32.totalorder %s19_s10, %s19_s10 }
   0x9   :  { %p67_p3 = scmp.ne.s32.totalorder %s19_s10, %s66_s18  ;;  %p72_p5 = scmp.lt.s32.totalorder %s66_s18, %s66_s18 }
   0xb   :  { %p73_p6 = por %p72_p5, %p71_p4 }
   0xd   :  { %p74_p7 = pnand %p73_p6, %p67_p3 }
   0xf   :  { %77 = shalt.err (!%p74_p7)
}
  0x10   :  { %21 = dma.hbm_to_vmem [thread:$0]  %s149_s1, 256, %s19_s10, [#allocation4]  }
  0x11   :  { %100 = dma.done.wait [#allocation4], 256  }
  0x12   :  { %101 = vsyncadd [#allocation4], 4294967040  ;;  %v28_v0 = vstv %s148_s0  ;;  %v26_v1 = vld [vmem:[#allocation3] sm:$0xff]  ;;  %v27_v2 = vld [vmem:[#allocation3 + $0x8] sm:$0xff]  ;;  %s105_s23 = smov [#allocation6]  }
  0x13   :  { %v29_v3 = vmul.f32 %v28_v0, %v26_v1  ;;  %v30_v4 = vmul.f32 %v28_v0, %v27_v2  ;;  %s41_s24 = sshll.u32 %s105_s23, 4  ;;  %s42_s24 = int_to_ptr.vmem [resolvable:$true] %s41_s24 }
  0x14   :  { %s78_s1 = scalar_lea.vmem %s42_s24, 256  ;;  %p83_p9 = scmp.lt.s32.totalorder %s42_s24, %s42_s24 }
  0x15   :  { %52 = vtanh.f32 %v29_v3  ;;  %p79_p8 = scmp.ne.s32.totalorder %s42_s24, %s78_s1  ;;  %p84_p10 = scmp.lt.s32.totalorder %s78_s1, %s78_s1 }
  0x16   :  { %54 = vtanh.f32 %v30_v4 }
  0x17   :  { %p85_p11 = por %p84_p10, %p83_p9 }
  0x19   :  { %p86_p12 = pnand %p85_p11, %p79_p8 }
  0x1f   :  { %v53_v5 = vpop.eup %52 }
  0x20   :  { %v55_v6 = vpop.eup %54  ;;  %33 = vst [vmem:[#allocation6] sm:$0xff] %v53_v5 }
  0x21   :  { %34 = vst [vmem:[#allocation6 + $0x8] sm:$0xff] %v55_v6 }
  0x22   :  { %89 = shalt.err (!%p86_p12)
}
  0x23   :  { %s90_s26 = scalar_lea.hbm %s150_s2, 256 }
  0x24   :  { %p91_p13 = scmp.ne.s32.totalorder %s150_s2, %s90_s26  ;;  %p94_p0 = scmp.lt.u32.totalorder %s90_s26, %s150_s2 }
  0x26   :  { %p96_p1 = pnand %p94_p0, %p91_p13 }
  0x28   :  { %99 = shalt.err (!%p96_p1)
}
  0x29   :  { %44 = dma.vmem_to_hbm [thread:$0]  %s42_s24, 256, %s150_s2, [#allocation5]  }
  0x2a   :  { %102 = dma.done.wait [#allocation5], 256  }
  0x2b   :  { %103 = vsyncadd [#allocation5], 4294967040 }
  0x2c   :  { %48 = vsyncpa [#allocation4], 1 }
  0x2d   :  { %49 = vsyncpa [#allocation5], 1 }

</bundles_post_ra>
